<compile_context>
chip_gen: v5e
topology: v5e:2x2
jax: 0.10.0
libtpu: 0.0.40
codegen_flags: <defaults>
</compile_context>

<pallas_src>
import functools

import jax
import jax.numpy as jnp
from jax import lax
from jax.experimental import pallas as pl
from jax.experimental.pallas import tpu as pltpu


def _ln_kernel(x_ref, g_ref, b_ref, o_ref, *, eps):
    x = x_ref[...].astype(jnp.float32)                  # (tile_rows, H)
    mean = jnp.mean(x, axis=-1, keepdims=True)          # (tile_rows, 1)
    mean_x2 = jnp.mean(x * x, axis=-1, keepdims=True)   # (tile_rows, 1)
    var = (mean_x2 - mean) ** 2                         # reference-module (quirky) semantics
    inv_std = lax.rsqrt(var + eps)                      # EUP rsqrt; avoids f32 VPU divide
    x_norm = (x - mean) * inv_std
    g = g_ref[...].astype(jnp.float32)                  # (1, H)
    b = b_ref[...].astype(jnp.float32)                  # (1, H)
    o_ref[...] = (g * x_norm + b).astype(o_ref.dtype)


def _sublane_align(dtype):
    # f32 -> 8, bf16 -> 16, int8/fp8 -> 32 (packed-sublane alignment).
    itemsize = jnp.dtype(dtype).itemsize
    return max(8, 32 // max(itemsize, 1))


def _vmem_capacity_bytes():
    try:
        return int(pltpu.get_tpu_info().vmem_capacity_bytes)
    except Exception:
        return 128 * 1024 * 1024  # conservative default (v5e/v6e)


def _pick_rows_per_tile(R, H, dtype, vmem_cap):
    """Large, generation-aware row tile: ~1/16 of physical VMEM of f32 working
    set per block (capped at 8 MiB). On v7x (64 MiB VMEM) that is ~4 MiB, on
    v5e/v6e (128 MiB) ~8 MiB, so double-buffered in+out plus f32 temporaries
    stay comfortably within the scoped-VMEM limit set below."""
    align = _sublane_align(dtype)
    # Size against the f32 working footprint (the kernel upcasts to f32).
    bytes_per_row = H * max(jnp.dtype(dtype).itemsize, 4)
    target_block_bytes = min(8 * 1024 * 1024, vmem_cap // 16)
    rows = target_block_bytes // max(bytes_per_row, 1)
    rows = max(align, (rows // align) * align)
    rows = min(rows, 1024)
    # Don't tile wider than what's needed to cover all rows (small-R demo case).
    rows = min(rows, max(align, -(-R // align) * align))
    return int(rows)


def layer_norm(x, gain, bias, *, eps=1e-5, rows_per_tile=None):
    """x: (..., H); gain/bias: (H,). Normalizes over the last axis."""
    orig_shape = x.shape
    H = orig_shape[-1]
    x2d = x.reshape(-1, H)
    R = x2d.shape[0]

    vmem_cap = _vmem_capacity_bytes()
    if rows_per_tile is None:
        rows_per_tile = _pick_rows_per_tile(R, H, x.dtype, vmem_cap)

    # Pad rows so any (performance-optimal) tile size works; padded rows are
    # dropped after the call. Padded rows are all-zero -> rsqrt(eps) is finite.
    R_pad = -(-R // rows_per_tile) * rows_per_tile
    if R_pad != R:
        x2d = jnp.pad(x2d, ((0, R_pad - R), (0, 0)))

    gain2d = gain.reshape(1, H)
    bias2d = bias.reshape(1, H)

    # Raise the scoped-VMEM limit to fit double-buffered in/out tiles plus the
    # in-kernel f32 temporaries, while leaving headroom (esp. on v7x's 64 MiB).
    in_out_block_bytes = rows_per_tile * H * jnp.dtype(x.dtype).itemsize
    f32_tile_bytes = rows_per_tile * H * 4
    vmem_limit = min(
        int(vmem_cap * 0.7),
        max(32 * 1024 * 1024, 4 * in_out_block_bytes + 6 * f32_tile_bytes),
    )

    kernel = functools.partial(_ln_kernel, eps=eps)
    out2d = pl.pallas_call(
        kernel,
        out_shape=jax.ShapeDtypeStruct((R_pad, H), x.dtype),
        grid_spec=pltpu.PrefetchScalarGridSpec(
            num_scalar_prefetch=0,
            grid=(R_pad // rows_per_tile,),
            in_specs=[
                pl.BlockSpec((rows_per_tile, H), lambda i: (i, 0)),
                pl.BlockSpec((1, H), lambda i: (0, 0)),
                pl.BlockSpec((1, H), lambda i: (0, 0)),
            ],
            out_specs=pl.BlockSpec((rows_per_tile, H), lambda i: (i, 0)),
        ),
        compiler_params=pltpu.CompilerParams(
            dimension_semantics=("parallel",),   # 2-TC sharding on v7x; no-op on v5e/v6e
            vmem_limit_bytes=int(vmem_limit),
        ),
    )(x2d, gain2d, bias2d)

    if R_pad != R:
        out2d = out2d[:R]
    return out2d.reshape(orig_shape)


def layer_norm_ref(x, gain, bias, eps=1e-5):
    # Pure-JAX reference with identical (buggy-variance) semantics.
    xf = x.astype(jnp.float32)
    mean = jnp.mean(xf, axis=-1, keepdims=True)
    mean_x2 = jnp.mean(xf * xf, axis=-1, keepdims=True)
    var = (mean_x2 - mean) ** 2
    x_norm = (xf - mean) / jnp.sqrt(var + eps)
    return (gain * x_norm + bias).astype(x.dtype)


if __name__ == "__main__":
    B, S, H = 2, 8, 32
    key = jax.random.PRNGKey(0)
    x = jax.random.normal(key, (B, S, H), dtype=jnp.float32)

    # Deterministic parameter init per the module's __init__ (elementwise_affine=True).
    gain = jnp.ones((H,), dtype=jnp.float32)
    bias = jnp.zeros((H,), dtype=jnp.float32)

    out = layer_norm(x, gain, bias, eps=1e-5)
    out = jax.block_until_ready(out)

    ref = layer_norm_ref(x, gain, bias, eps=1e-5)
    assert out.shape == x.shape and out.dtype == x.dtype
    assert jnp.allclose(out, ref, atol=1e-5, rtol=1e-5), "mismatch vs reference"
    print("KERNEL_OK")
</pallas_src>

<mosaic_0001>
module attributes {stable_mosaic.version = 11 : i64} {
  func.func @_ln_kernel(%arg0: i32, %arg1: memref<16x32xf32, #tpu.memory_space<vmem>>, %arg2: memref<1x32xf32, #tpu.memory_space<vmem>>, %arg3: memref<1x32xf32, #tpu.memory_space<vmem>>, %arg4: memref<16x32xf32, #tpu.memory_space<vmem>>) attributes {dimension_semantics = [#tpu.dimension_semantics<parallel>], iteration_bounds = array<i64: 1>, scalar_prefetch = 0 : i64, scratch_operands = 0 : i64, tpu.core_type = #tpu.core_type<tc>, window_params = [{transform_indices = @transform_0, window_bounds = array<i64: 16, 32>}, {pipeline_mode = #tpu.pipeline_mode<synchronous>, transform_indices = @transform_1, window_bounds = array<i64: 1, 32>}, {pipeline_mode = #tpu.pipeline_mode<synchronous>, transform_indices = @transform_2, window_bounds = array<i64: 1, 32>}, {transform_indices = @transform_3, window_bounds = array<i64: 16, 32>}]} {
    %c0 = arith.constant 0 : index
    %c0_0 = arith.constant 0 : index
    %0 = vector.load %arg1[%c0, %c0_0] : memref<16x32xf32, #tpu.memory_space<vmem>>, vector<16x32xf32>
    %cst = arith.constant dense<0.000000e+00> : vector<16xf32>
    %1 = vector.multi_reduction <add>, %0, %cst [1] : vector<16x32xf32> to vector<16xf32>
    %2 = vector.shape_cast %1 : vector<16xf32> to vector<16x1xf32>
    %cst_1 = arith.constant 3.200000e+01 : f32
    %3 = vector.broadcast %cst_1 : f32 to vector<16x1xf32>
    %4 = arith.divf %2, %3 : vector<16x1xf32>
    %5 = arith.mulf %0, %0 : vector<16x32xf32>
    %cst_2 = arith.constant dense<0.000000e+00> : vector<16xf32>
    %6 = vector.multi_reduction <add>, %5, %cst_2 [1] : vector<16x32xf32> to vector<16xf32>
    %7 = vector.shape_cast %6 : vector<16xf32> to vector<16x1xf32>
    %cst_3 = arith.constant 3.200000e+01 : f32
    %8 = vector.broadcast %cst_3 : f32 to vector<16x1xf32>
    %9 = arith.divf %7, %8 : vector<16x1xf32>
    %10 = arith.subf %9, %4 : vector<16x1xf32>
    %11 = arith.mulf %10, %10 : vector<16x1xf32>
    %cst_4 = arith.constant 9.99999974E-6 : f32
    %12 = vector.broadcast %cst_4 : f32 to vector<16x1xf32>
    %13 = arith.addf %11, %12 : vector<16x1xf32>
    %14 = math.rsqrt %13 : vector<16x1xf32>
    %15 = vector.broadcast %4 : vector<16x1xf32> to vector<16x32xf32>
    %16 = arith.subf %0, %15 : vector<16x32xf32>
    %17 = vector.broadcast %14 : vector<16x1xf32> to vector<16x32xf32>
    %18 = arith.mulf %16, %17 : vector<16x32xf32>
    %c0_5 = arith.constant 0 : index
    %c0_6 = arith.constant 0 : index
    %19 = vector.load %arg2[%c0_5, %c0_6] : memref<1x32xf32, #tpu.memory_space<vmem>>, vector<1x32xf32>
    %c0_7 = arith.constant 0 : index
    %c0_8 = arith.constant 0 : index
    %20 = vector.load %arg3[%c0_7, %c0_8] : memref<1x32xf32, #tpu.memory_space<vmem>>, vector<1x32xf32>
    %21 = vector.broadcast %19 : vector<1x32xf32> to vector<16x32xf32>
    %22 = arith.mulf %21, %18 : vector<16x32xf32>
    %23 = vector.broadcast %20 : vector<1x32xf32> to vector<16x32xf32>
    %24 = arith.addf %22, %23 : vector<16x32xf32>
    %c0_9 = arith.constant 0 : index
    %c0_10 = arith.constant 0 : index
    %25 = vector.load %arg4[%c0_9, %c0_10] : memref<16x32xf32, #tpu.memory_space<vmem>>, vector<16x32xf32>
    tpu.vector_store %arg4[%c0_9, %c0_10], %24 {strides = array<i32>} : memref<16x32xf32, #tpu.memory_space<vmem>>, vector<16x32xf32>,
    return
  }
  func.func @transform_0(%arg0: i32) -> (i32, i32) {
    %c0_i32 = arith.constant 0 : i32
    %c0_i32_0 = arith.constant 0 : i32
    return %arg0, %c0_i32 : i32, i32
  }
  func.func @transform_1(%arg0: i32) -> (i32, i32) {
    %c0_i32 = arith.constant 0 : i32
    %c0_i32_0 = arith.constant 0 : i32
    %c0_i32_1 = arith.constant 0 : i32
    return %c0_i32, %c0_i32_0 : i32, i32
  }
  func.func @transform_2(%arg0: i32) -> (i32, i32) {
    %c0_i32 = arith.constant 0 : i32
    %c0_i32_0 = arith.constant 0 : i32
    %c0_i32_1 = arith.constant 0 : i32
    return %c0_i32, %c0_i32_0 : i32, i32
  }
  func.func @transform_3(%arg0: i32) -> (i32, i32) {
    %c0_i32 = arith.constant 0 : i32
    %c0_i32_0 = arith.constant 0 : i32
    return %arg0, %c0_i32 : i32, i32
  }
}

</mosaic_0001>

<bundles_post_ra>
// kernel: tpu_custom_call.1
= control target key start
LH: loop header
LB: loop body
LE: loop exit
PB: predicated region body
PF: predicated region fallthrough
CT: control target
= control target key end

     0   :  { %8 = vsyncpa [#allocation3], 0  ;;  %s279_s0 = inlined_call_operand.hbm [shape: f32[16,32], index: 0, kind: input, shape index: {}]   ;;  %s280_s1 = inlined_call_operand.hbm [shape: f32[1,32], index: 1, kind: input, shape index: {}]   ;;  %s281_s2 = inlined_call_operand.vmem [shape: f32[1,32], index: 2, kind: input, shape index: {}]   ;;  %s282_s3 = inlined_call_operand.hbm [shape: f32[16,32], index: 3, kind: output, shape index: {}]  }
   0x1   :  { %9 = vsyncpa [#allocation6], 0 }
   0x2   :  { %10 = vsyncpa [#allocation4], 0  ;;  %s15_s14 = sshll.u32 %s279_s0, 4  ;;  %s229_s15 = smov [#allocation2]   ;;  %s16_s14 = int_to_ptr.hbm [resolvable:$true] %s15_s14 }
   0x3   :  { %s17_s16 = sshll.u32 %s229_s15, 4  ;;  %s29_s19 = sshll.u32 %s280_s1, 4  ;;  %s18_s16 = int_to_ptr.vmem [resolvable:$true] %s17_s16  ;;  %s30_s19 = int_to_ptr.hbm [resolvable:$true] %s29_s19 }
   0x4   :  { %s230_s20 = smov 128   ;;  %s231_s21 = smov 8  }
   0x5   :  { %23 = dma.hbm_to_vmem [thread:$0]  %s16_s14, 256, %s18_s16, [#allocation3], %s230_s20, %s230_s20, %s231_s21  }
   0x6   :  { %s232_s22 = smov [#allocation5]  }
   0x7   :  { %s31_s23 = sshll.u32 %s232_s22, 4  ;;  %s32_s23 = int_to_ptr.vmem [resolvable:$true] %s31_s23 }
   0x8   :  { %34 = dma.hbm_to_vmem [thread:$0]  %s30_s19, 16, %s32_s23, [#allocation6]  }
   0x9   :  { %223 = dma.done.wait [#allocation3], 256  }
   0xa   :  { %224 = vsyncadd [#allocation3], 4294967040 }
   0xb   :  { %225 = dma.done.wait [#allocation6], 16  }
   0xc   :  { %226 = vsyncadd [#allocation6], 4294967280  ;;  %vm47_vm0 = vcmask 261120   ;;  %v45_v0 = vld [vmem:[#allocation2] sm:$0xff]  ;;  %v46_v3 = vld [vmem:[#allocation2 + $0x8] sm:$0xff]  ;;  %v233_v8 = vmov 32.0  }
   0xd   :  { %v63_v1 = vmul.f32 %v45_v0, %v45_v0  ;;  %v48_v2 = vsel %vm47_vm0, %v45_v0, 0.0  ;;  %v64_v5 = vmul.f32 %v46_v3, %v46_v3  ;;  %v51_v6 = vsel %vm47_vm0, %v46_v3, 0.0  ;;  %v143_v37 = vld [vmem:[#allocation5] ss:$0 sm:$0xff]  ;;  %v144_v41 = vld [vmem:[%s281_s2] ss:$0 sm:$0xff] }
   0xe   :  { %49 = vadd.xlane.f32.xlu0 %v48_v2  ;;  %145 = vrcp.f32 %v233_v8  ;;  %s234_s24 = smov [#allocation7]   ;;  %s123_s2 = sshll.u32 %s282_s3, 4  ;;  %s124_s2 = int_to_ptr.hbm [resolvable:$true] %s123_s2 }
   0xf   :  { %v65_v4 = vsel %vm47_vm0, %v63_v1, 0.0  ;;  %v68_v7 = vsel %vm47_vm0, %v64_v5, 0.0  ;;  %s121_s25 = sshll.u32 %s234_s24, 4  ;;  %s122_s25 = int_to_ptr.vmem [resolvable:$true] %s121_s25 }
  0x10   :  { %66 = vadd.xlane.f32.xlu1 %v65_v4 }
  0x14   :  { %v146_v9 = vpop.eup %145 }
  0x15   :  { %v55_v10 = vmul.f32 32.0, %v146_v9  ;;  %vm59_vm1 = vweird.f32 %v146_v9 }
  0x16   :  { %52 = vadd.xlane.f32.xlu0 %v51_v6 }
  0x17   :  { %v56_v11 = vsub.f32 1.0, %v55_v10 }
  0x18   :  { %69 = vadd.xlane.f32.xlu1 %v68_v7 }
  0x19   :  { %v57_v12 = vmul.f32 %v146_v9, %v56_v11 }
  0x1b   :  { %v58_v13 = vadd.f32 %v146_v9, %v57_v12 }
  0x1d   :  { %v60_v14 = vsel %vm59_vm1, %v146_v9, %v58_v13 }
  0x81   :  { %v50_v15 = vpop.xlane.xlu0 %49 }
  0x82   :  { %v61_v16 = vmul.f32 %v60_v14, %v50_v15 }
  0x83   :  { %v67_v17 = vpop.xlane.xlu1 %66 }
  0x84   :  { %v71_v18 = vmul.f32 %v67_v17, %v60_v14  ;;  %v99_v38 = vsub.f32 %v45_v0, %v61_v16 }
  0x86   :  { %v73_v19 = vsub.f32 %v71_v18, %v61_v16 }
  0x88   :  { %v75_v20 = vmul.f32 %v73_v19, %v73_v19 }
  0x89   :  { %v53_v21 = vpop.xlane.xlu0 %52 }
  0x8a   :  { %v77_v22 = vadd.f32 1e-05, %v75_v20  ;;  %v62_v23 = vmul.f32 %v60_v14, %v53_v21 }
  0x8b   :  { %v70_v24 = vpop.xlane.xlu1 %69 }
  0x8c   :  { %147 = vrsqrt.f32 %v77_v22  ;;  %v72_v25 = vmul.f32 %v70_v24, %v60_v14  ;;  %vm85_vm3 = vweird.f32 %v77_v22  ;;  %v100_v48 = vsub.f32 %v46_v3, %v62_v23 }
  0x8e   :  { %v74_v26 = vsub.f32 %v72_v25, %v62_v23 }
  0x90   :  { %v76_v27 = vmul.f32 %v74_v26, %v74_v26 }
  0x92   :  { %v148_v28 = vpop.eup %147  ;;  %v78_v29 = vadd.f32 1e-05, %v76_v27 }
  0x93   :  { %v80_v30 = vmul.f32 %v148_v28, %v77_v22  ;;  %vm86_vm2 = vweird.f32 %v148_v28 }
  0x94   :  { %149 = vrsqrt.f32 %v78_v29  ;;  %vm87_vm4 = vmor %vm85_vm3, %vm86_vm2  ;;  %vm95_vm6 = vweird.f32 %v78_v29 }
  0x95   :  { %v81_v31 = vmul.f32 %v148_v28, %v80_v30 }
  0x97   :  { %v82_v32 = vmul.f32 0.5, %v81_v31 }
  0x99   :  { %v83_v33 = vsub.f32 1.5, %v82_v32 }
  0x9a   :  { %v150_v34 = vpop.eup %149 }
  0x9b   :  { %v84_v35 = vmul.f32 %v148_v28, %v83_v33  ;;  %v90_v36 = vmul.f32 %v150_v34, %v78_v29  ;;  %vm96_vm5 = vweird.f32 %v150_v34 }
  0x9c   :  { %vm97_vm7 = vmor %vm95_vm6, %vm96_vm5 }
  0x9d   :  { %v88_v39 = vsel %vm87_vm4, %v148_v28, %v84_v35  ;;  %v91_v40 = vmul.f32 %v150_v34, %v90_v36 }
  0x9e   :  { %v101_v42 = vmul.f32 %v99_v38, %v88_v39 }
  0x9f   :  { %v92_v43 = vmul.f32 0.5, %v91_v40 }
  0xa0   :  { %v108_v44 = vmul.f32 %v143_v37, %v101_v42 }
  0xa1   :  { %v93_v45 = vsub.f32 1.5, %v92_v43 }
  0xa2   :  { %v113_v46 = vadd.f32 %v144_v41, %v108_v44 }
  0xa3   :  { %v94_v47 = vmul.f32 %v150_v34, %v93_v45 }
  0xa4   :  { %115 = vst.msk [vmem:[#allocation7] sm:$0xff] %vm47_vm0, %v113_v46 }
  0xa5   :  { %v98_v49 = vsel %vm97_vm7, %v150_v34, %v94_v47 }
  0xa6   :  { %v102_v50 = vmul.f32 %v100_v48, %v98_v49 }
  0xa8   :  { %v109_v51 = vmul.f32 %v143_v37, %v102_v50 }
  0xaa   :  { %v114_v52 = vadd.f32 %v144_v41, %v109_v51 }
  0xac   :  { %116 = vst.msk [vmem:[#allocation7 + $0x8] sm:$0xff] %vm47_vm0, %v114_v52 }
  0xad   :  { %129 = dma.vmem_to_hbm [thread:$0]  %s122_s25, 256, %s124_s2, [#allocation4], %s230_s20, %s230_s20, %s231_s21  }
  0xae   :  { %227 = dma.done.wait [#allocation4], 256  }
  0xaf   :  { %228 = vsyncadd [#allocation4], 4294967040 }
  0xb0   :  { %134 = vsyncpa [#allocation3], 1 }
  0xb1   :  { %135 = vsyncpa [#allocation6], 1 }
  0xb2   :  { %136 = vsyncpa [#allocation4], 1 }

</bundles_post_ra>
